<compile_context>
chip_gen: v5e
topology: v5e:2x2
jax: 0.10.0
libtpu: 0.0.40
codegen_flags: <defaults>
</compile_context>

<pallas_src>
import functools
import math
from typing import List, Optional

import jax
import jax.numpy as jnp
from jax.experimental import pallas as pl
from jax.experimental.pallas import tpu as pltpu


# Generation-safe budgets: table + one-hot + double-buffered blocks stay well
# under v5e's 16 MiB default scoped VMEM and v7x's 64 MiB physical VMEM.
_RESIDENT_MAX_TOKENS = 1024
_RESIDENT_MAX_TABLE_BYTES = 4 * 1024 * 1024
_RESIDENT_TB = 256          # tokens per grid step, table-resident path
_DMA_TB = 64                # tokens per grid step, manual-DMA path


def _round_up(x: int, m: int) -> int:
    return ((x + m - 1) // m) * m


# --------------------------- Pallas kernels -------------------------------- #

def _resident_gather_kernel(idx_ref, emb_ref, out_ref):
    """Table-resident gather: one-hot(token ids) @ table on the MXU.

    idx_ref : (TB, 1) int32 token ids for this block (VMEM, sublane-major)
    emb_ref : (n_tokens, emb_size) full table, resident in VMEM
    out_ref : (TB, emb_size) dense output block
    """
    tb = out_ref.shape[0]
    n_tokens = emb_ref.shape[0]
    idx = idx_ref[...]                                               # (TB, 1)
    iota = jax.lax.broadcasted_iota(jnp.int32, (tb, n_tokens), 1)    # (TB, n_tokens)
    onehot = (idx == iota).astype(emb_ref.dtype)                     # (TB, n_tokens)
    # Exact for finite table values: the single 1.0*row term reconstructs the
    # row; 0.0 terms vanish in the f32 accumulate.
    out_ref[...] = jnp.dot(
        onehot, emb_ref[...], preferred_element_type=jnp.float32
    ).astype(out_ref.dtype)


def _dma_gather_kernel(idx_ref, emb_hbm, out_ref, rows, sems, *, tb):
    """Large-table gather: TB row DMAs HBM->VMEM scratch, then one dense store.

    idx_ref : (T_pad,) int32 in SMEM (scalar prefetch)
    emb_hbm : (n_tokens, emb_size) table left in HBM (memory_space=pl.ANY)
    out_ref : (TB, emb_size) VMEM output block
    rows    : (TB, emb_size) VMEM scratch
    sems    : (TB,) DMA semaphores (one per in-flight row copy)
    """
    base = pl.program_id(0) * tb

    @pl.loop(0, tb)
    def _start(j):
        r = idx_ref[base + j]
        pltpu.make_async_copy(
            emb_hbm.at[pl.ds(r, 1), :],
            rows.at[pl.ds(j, 1), :],
            sems.at[j],
        ).start()

    @pl.loop(0, tb)
    def _wait(j):
        pltpu.make_async_copy(
            emb_hbm.at[pl.ds(0, 1), :],
            rows.at[pl.ds(j, 1), :],
            sems.at[j],
        ).wait()

    out_ref[...] = rows[...]


# ----------------------------- wrappers ------------------------------------ #

def _gather_table_resident(emb: jax.Array, idx: jax.Array) -> jax.Array:
    n_tokens, emb_size = emb.shape
    t = idx.shape[0]
    tb = min(_RESIDENT_TB, _round_up(t, 8))
    nblk = -(-t // tb)
    t_pad = nblk * tb
    if t_pad != t:
        idx = jnp.pad(idx, (0, t_pad - t))       # pad with row 0, sliced off below
    idx2d = idx.reshape(t_pad, 1)                # ids on the sublane axis

    itemsize = emb.dtype.itemsize
    cost = pl.CostEstimate(
        flops=2 * t_pad * n_tokens * emb_size,
        transcendentals=0,
        bytes_accessed=(n_tokens * emb_size + t_pad * emb_size) * itemsize + t_pad * 4,
    )
    out = pl.pallas_call(
        _resident_gather_kernel,
        out_shape=jax.ShapeDtypeStruct((t_pad, emb_size), emb.dtype),
        grid_spec=pltpu.PrefetchScalarGridSpec(
            num_scalar_prefetch=0,
            grid=(nblk,),
            in_specs=[
                pl.BlockSpec((tb, 1), lambda i: (i, 0)),
                # Constant index_map -> table copied HBM->VMEM once and kept
                # resident across all grid steps.
                pl.BlockSpec((n_tokens, emb_size), lambda i: (0, 0)),
            ],
            out_specs=pl.BlockSpec((tb, emb_size), lambda i: (i, 0)),
        ),
        compiler_params=pltpu.CompilerParams(
            dimension_semantics=("parallel",)),
        cost_estimate=cost,
    )(idx2d, emb)
    return out[:t] if t_pad != t else out


def _gather_dma(emb: jax.Array, idx: jax.Array) -> jax.Array:
    n_tokens, emb_size = emb.shape
    t = idx.shape[0]
    tb = _DMA_TB
    nblk = -(-t // tb)
    t_pad = nblk * tb
    if t_pad != t:
        idx = jnp.pad(idx, (0, t_pad - t))

    itemsize = emb.dtype.itemsize
    cost = pl.CostEstimate(
        flops=0,
        transcendentals=0,
        bytes_accessed=2 * t_pad * emb_size * itemsize + t_pad * 4,
    )
    out = pl.pallas_call(
        functools.partial(_dma_gather_kernel, tb=tb),
        out_shape=jax.ShapeDtypeStruct((t_pad, emb_size), emb.dtype),
        grid_spec=pltpu.PrefetchScalarGridSpec(
            num_scalar_prefetch=1,                           # token ids -> SMEM
            grid=(nblk,),
            in_specs=[pl.BlockSpec(memory_space=pl.ANY)],    # table stays in HBM
            out_specs=pl.BlockSpec((tb, emb_size), lambda i, idx_ref: (i, 0)),
            scratch_shapes=[
                pltpu.VMEM((tb, emb_size), emb.dtype),
                pltpu.SemaphoreType.DMA((tb,)),
            ],
        ),
        compiler_params=pltpu.CompilerParams(
            dimension_semantics=("parallel",)),
        cost_estimate=cost,
    )(idx, emb)
    return out[:t] if t_pad != t else out


def embedding_gather(emb: jax.Array, token_index: jax.Array) -> jax.Array:
    """emb[token_index] via a Pallas TPU kernel (batched row gather)."""
    n_tokens, emb_size = emb.shape
    # torch raises on OOB indices; here an OOB data-dependent DMA would fault,
    # so clamp (no-op for valid inputs).
    idx = jnp.clip(token_index.astype(jnp.int32), 0, n_tokens - 1)
    table_bytes = n_tokens * emb_size * emb.dtype.itemsize
    if n_tokens <= _RESIDENT_MAX_TOKENS and table_bytes <= _RESIDENT_MAX_TABLE_BYTES:
        return _gather_table_resident(emb, idx)
    return _gather_dma(emb, idx)


# --------------------------- module equivalent ----------------------------- #

class StaticGraphEmbedding:
    """JAX/Pallas equivalent of spin.models.spin.StaticGraphEmbedding.

    Only the eager-init path (n_tokens > 0) with the default 'uniform'
    initializer is materialized here (deterministic, in-script).
    """

    def __init__(self, n_tokens: int, emb_size: int, key: jax.Array,
                 dtype=jnp.float32):
        assert emb_size > 0 and n_tokens > 0
        self.n_tokens = int(n_tokens)
        self.emb_size = int(emb_size)
        # inits.uniform(emb_size, emb): U(-1/sqrt(emb_size), 1/sqrt(emb_size)).
        bound = 1.0 / math.sqrt(emb_size)
        # Note: dtype=jnp.bfloat16 halves HBM traffic of the gather if desired.
        self.emb = jax.random.uniform(
            key, (n_tokens, emb_size), jnp.float32,
            minval=-bound, maxval=bound).astype(dtype)
        # TODO(synk): lazy init (UninitializedParameter + forward pre-hook) and
        # the non-default initializers (glorot/kaiming/from_values) have no
        # Pallas/JAX equivalent here; eager 'uniform' init only.

    def __call__(self,
                 expand: Optional[List[int]] = None,
                 token_index: Optional[jax.Array] = None,
                 tokens_first: bool = True) -> jax.Array:
        if token_index is None:
            # Identity gather: torch returns the parameter itself; launching a
            # kernel to copy it row-by-row is pure overhead.
            emb = self.emb
        else:
            emb = embedding_gather(self.emb, token_index)

        if not tokens_first:
            emb = emb.T

        if expand is None:
            return emb

        # Replicate torch's view/expand bookkeeping exactly.
        shape = list(emb.shape)
        view = [1 if d > 0 else shape.pop(0 if tokens_first else -1)
                for d in expand]
        target = [d if d > 0 else view[i] for i, d in enumerate(expand)]
        return jnp.broadcast_to(emb.reshape(view), target)


# --------------------------------- main ------------------------------------ #

if __name__ == "__main__":
    key = jax.random.PRNGKey(0)
    k_emb, k_idx, k_emb2, k_idx2 = jax.random.split(key, 4)

    # ---- small table: exercises the table-resident (VMEM) gather path ----
    n_tokens, emb_size = 16, 32
    module = StaticGraphEmbedding(n_tokens, emb_size, k_emb)

    # (1) plain table fetch (token_index=None): no kernel launch, exact view.
    out_plain = jax.block_until_ready(module())
    assert out_plain.shape == (n_tokens, emb_size)
    assert jnp.array_equal(out_plain, module.emb)

    # (2) gather with token_index + expand over a leading batch dim.
    token_index = jax.random.randint(k_idx, (8,), 0, n_tokens, dtype=jnp.int32)
    batch = 2
    out_exp = jax.block_until_ready(
        module(expand=[batch, -1, -1], token_index=token_index,
               tokens_first=True))
    assert out_exp.shape == (batch, 8, emb_size)
    ref = jnp.broadcast_to(module.emb[token_index][None], (batch, 8, emb_size))
    assert jnp.allclose(out_exp, ref, atol=1e-6, rtol=0)

    # (3) tokens_first=False path (transposed embedding).
    out_t = jax.block_until_ready(
        module(token_index=token_index, tokens_first=False))
    assert out_t.shape == (emb_size, 8)
    assert jnp.allclose(out_t, module.emb[token_index].T, atol=1e-6, rtol=0)

    # ---- larger table: exercises the batched manual-DMA gather path ----
    n_tokens2, emb_size2 = 2048, 32          # > _RESIDENT_MAX_TOKENS
    module2 = StaticGraphEmbedding(n_tokens2, emb_size2, k_emb2)
    token_index2 = jax.random.randint(k_idx2, (20,), 0, n_tokens2,
                                      dtype=jnp.int32)
    out2 = jax.block_until_ready(module2(token_index=token_index2))
    assert out2.shape == (20, emb_size2)
    assert jnp.array_equal(out2, module2.emb[token_index2])

    print("KERNEL_OK")
</pallas_src>

<mosaic_0001>
module attributes {stable_mosaic.version = 11 : i64} {
  func.func @_resident_gather_kernel(%arg0: i32, %arg1: memref<8x1xi32, #tpu.memory_space<vmem>>, %arg2: memref<16x32xf32, #tpu.memory_space<vmem>>, %arg3: memref<8x32xf32, #tpu.memory_space<vmem>>) attributes {dimension_semantics = [#tpu.dimension_semantics<parallel>], iteration_bounds = array<i64: 1>, scalar_prefetch = 0 : i64, scratch_operands = 0 : i64, tpu.core_type = #tpu.core_type<tc>, window_params = [{transform_indices = @transform_0, window_bounds = array<i64: 8, 1>}, {pipeline_mode = #tpu.pipeline_mode<synchronous>, transform_indices = @transform_1, window_bounds = array<i64: 16, 32>}, {transform_indices = @transform_2, window_bounds = array<i64: 8, 32>}]} {
    %c0 = arith.constant 0 : index
    %c0_0 = arith.constant 0 : index
    %0 = vector.load %arg1[%c0, %c0_0] : memref<8x1xi32, #tpu.memory_space<vmem>>, vector<8x1xi32>
    %1 = tpu.iota {dimensions = array<i32: 1>} : vector<8x16xi32>
    %2 = vector.broadcast %0 : vector<8x1xi32> to vector<8x16xi32>
    %3 = arith.cmpi eq, %2, %1 : vector<8x16xi32>
    %4 = arith.extui %3 : vector<8x16xi1> to vector<8x16xi32>
    %5 = arith.sitofp %4 : vector<8x16xi32> to vector<8x16xf32>
    %c0_1 = arith.constant 0 : index
    %c0_2 = arith.constant 0 : index
    %6 = vector.load %arg2[%c0_1, %c0_2] : memref<16x32xf32, #tpu.memory_space<vmem>>, vector<16x32xf32>
    %cst = arith.constant dense<0.000000e+00> : vector<8x32xf32>
    %7 = tpu.matmul %5, %6, %cst {dimension_numbers = #tpu.dot_dimension_numbers<[1], [0], [0], [1], [0, 0, 1, 1], [], []>} : vector<8x16xf32>, vector<16x32xf32>, vector<8x32xf32> -> vector<8x32xf32>
    %c0_3 = arith.constant 0 : index
    %c0_4 = arith.constant 0 : index
    %8 = vector.load %arg3[%c0_3, %c0_4] : memref<8x32xf32, #tpu.memory_space<vmem>>, vector<8x32xf32>
    tpu.vector_store %arg3[%c0_3, %c0_4], %7 {strides = array<i32>} : memref<8x32xf32, #tpu.memory_space<vmem>>, vector<8x32xf32>,
    return
  }
  func.func @transform_0(%arg0: i32) -> (i32, i32) {
    %c0_i32 = arith.constant 0 : i32
    %c0_i32_0 = arith.constant 0 : i32
    return %arg0, %c0_i32 : i32, i32
  }
  func.func @transform_1(%arg0: i32) -> (i32, i32) {
    %c0_i32 = arith.constant 0 : i32
    %c0_i32_0 = arith.constant 0 : i32
    %c0_i32_1 = arith.constant 0 : i32
    return %c0_i32, %c0_i32_0 : i32, i32
  }
  func.func @transform_2(%arg0: i32) -> (i32, i32) {
    %c0_i32 = arith.constant 0 : i32
    %c0_i32_0 = arith.constant 0 : i32
    return %arg0, %c0_i32 : i32, i32
  }
}

</mosaic_0001>

<bundles_post_ra>
// kernel: tpu_custom_call.1
= control target key start
LH: loop header
LB: loop body
LE: loop exit
PB: predicated region body
PF: predicated region fallthrough
CT: control target
= control target key end

     0   :  { %7 = vsyncpa [#allocation3], 0  ;;  %s173_s0 = inlined_call_operand.vmem [shape: s32[8,1], index: 0, kind: input, shape index: {}]   ;;  %s174_s1 = inlined_call_operand.hbm [shape: f32[16,32], index: 1, kind: input, shape index: {}]   ;;  %s175_s2 = inlined_call_operand.hbm [shape: f32[8,32], index: 2, kind: output, shape index: {}]  }
   0x1   :  { %8 = vsyncpa [#allocation4], 0  ;;  %s15_s11 = sshll.u32 %s174_s1, 4  ;;  %s143_s12 = smov [#allocation2]   ;;  %s16_s11 = int_to_ptr.hbm [resolvable:$true] %s15_s11 }
   0x2   :  { %s17_s13 = sshll.u32 %s143_s12, 4  ;;  %s144_s14 = smov 128   ;;  %s18_s13 = int_to_ptr.vmem [resolvable:$true] %s17_s13 }
   0x3   :  { %s145_s15 = smov 8  }
   0x4   :  { %23 = dma.hbm_to_vmem [thread:$0]  %s16_s11, 256, %s18_s13, [#allocation3], %s144_s14, %s144_s14, %s145_s15  }
   0x5   :  { %139 = dma.done.wait [#allocation3], 256  }
   0x6   :  { %140 = vsyncadd [#allocation3], 4294967040  ;;  %v146_v0 = vmov 0   ;;  %v28_v1 = vld [vmem:[%s173_s0] sm:$0xff]  ;;  %v38_v2 = vld [vmem:[#allocation2 + $0x8] sm:$0xff]  ;;  %v29_v4 = vlaneseq  ;;  %vm39_vm0 = vcmask 130048  }
   0x7   :  { %90 = vset.pattern.permute.xlu0 %v146_v0  ;;  %57 = vmatpush.msra.mxu0 %v38_v2  ;;  %v37_v3 = vld [vmem:[#allocation2] sm:$0xff]  ;;  %v147_v7 = vmov 0.0   ;;  %s148_s1 = smov [#allocation5]   ;;  %s72_s21 = sshll.u32 %s175_s2, 4  ;;  %vm63_vm2 = vcmask 261120   ;;  %s73_s21 = int_to_ptr.hbm [resolvable:$true] %s72_s21 }
   0x8   :  { %32 = vperm.xlu0 %90, %v28_v1   ;;  %v30_v5 = vand.u32 127, %v29_v4  ;;  %s70_s18 = sshll.u32 %s148_s1, 4  ;;  %s71_s18 = int_to_ptr.vmem [resolvable:$true] %s70_s18 }
   0x9   :  { %58 = vmatpush.msra.mxu0 %v37_v3 }
  0x7a   :  { %v33_v6 = vpop.permute.xlu0 %32 }
  0x7b   :  { %vm34_vm1 = vcmp.eq.s32.totalorder %v33_v6, %v30_v5 }
  0x7c   :  { %v82_v8 = vsel %vm34_vm1, 1.0, %v147_v7 }
  0x7d   :  { %83 = vmatmul.msk.f32.vlgmr.msra.gmra.mxu0 %vm39_vm0, %v82_v8 }
  0xfa   :  { %v60_v9 = vpop.f32.mrf.mxu0 }
  0xfb   :  { %64 = vst.msk [vmem:[#allocation5] sm:$0xff] %vm63_vm2, %v60_v9 }
  0xfc   :  { %75 = dma.vmem_to_hbm [thread:$0]  %s71_s18, 128, %s73_s21, [#allocation4]  }
  0xfd   :  { %141 = dma.done.wait [#allocation4], 128  }
  0xfe   :  { %142 = vsyncadd [#allocation4], 4294967168 }
  0xff   :  { %80 = vsyncpa [#allocation3], 1 }
 0x100   :  { %81 = vsyncpa [#allocation4], 1 }

</bundles_post_ra>
